<compile_context>
chip_gen: v7x
topology: tpu7x:2x2x1
jax: 0.10.0
libtpu: 0.0.40
codegen_flags: <defaults>
</compile_context>

<pallas_src>
import math

import jax
import jax.numpy as jnp
from jax.experimental import pallas as pl
from jax.experimental.pallas import tpu as pltpu


def make_gpn_encoder_kernel(reassociate_gc1):
    """Kernel factory; `reassociate_gc1` is a static compile-time bool."""

    def kernel(x_ref, adj_ref, w1_ref, b1_ref, w2_ref, b2_ref, out_ref):
        GB, N, F = x_ref.shape
        H1 = w1_ref.shape[1]
        Hp = w2_ref.shape[1]

        # Cast to bf16 on the VPU after the f32 blocks land in VMEM.
        x = x_ref[...].astype(jnp.bfloat16)       # (GB, N, F)
        adj = adj_ref[...].astype(jnp.bfloat16)   # (GB, N, N)

        # ---- gc1: relu(adj @ x @ W1 + b1), f32 accumulate ----
        if reassociate_gc1:
            # (adj @ x) @ W1 : N x N contraction emits width F (< H1)
            ax = jnp.einsum('gnm,gmf->gnf', adj, x,
                            preferred_element_type=jnp.float32)
            ax2 = ax.reshape(GB * N, F).astype(jnp.bfloat16)
            h1 = jnp.dot(ax2, w1_ref[...], preferred_element_type=jnp.float32)
            h1 = jnp.maximum(h1 + b1_ref[...], 0.0)          # (GB*N, H1) f32
        else:
            # adj @ (x @ W1)
            x2 = x_ref[...].reshape(GB * N, F).astype(jnp.bfloat16)
            s1 = jnp.dot(x2, w1_ref[...], preferred_element_type=jnp.float32)
            s1 = s1.reshape(GB, N, H1).astype(jnp.bfloat16)
            h1 = jnp.einsum('gnm,gmh->gnh', adj, s1,
                            preferred_element_type=jnp.float32)
            h1 = jnp.maximum(h1 + b1_ref[...], 0.0).reshape(GB * N, H1)

        # dropout: F.dropout(..., training=self.training) -> identity at inference

        # ---- gc2: adj @ (h1 @ W2) + b2, no relu ----
        s2 = jnp.dot(h1.astype(jnp.bfloat16), w2_ref[...],
                     preferred_element_type=jnp.float32)      # (GB*N, Hp)
        s2 = s2.reshape(GB, N, Hp).astype(jnp.bfloat16)
        h2 = jnp.einsum('gnm,gmh->gnh', adj, s2,
                        preferred_element_type=jnp.float32)   # (GB, N, Hp)
        out_ref[...] = (h2 + b2_ref[...]).astype(out_ref.dtype)

    return kernel


def _pick_graphs_per_step(B, N):
    """Graphs per grid step: target M = GB*N >= 128, keep >=2 parallel steps
    for v7x's two TensorCores when the batch allows it."""
    target = max(1, -(-128 // N))                       # ceil(128 / N)
    divisors = [d for d in range(1, B + 1) if B % d == 0]
    cands = [d for d in divisors if d >= target and B // d >= 2]
    if cands:
        return min(cands)
    cands = [d for d in divisors if d >= target]
    if cands:
        return min(cands)
    return B


def gpn_encoder(x, adj, params):
    """Batched GPN_Encoder forward.

    x:   (B, N, nfeat) float32
    adj: (B, N, N)     float32
    params = (w1, b1, w2, b2) with w1:(nfeat, 2*nhid), b1:(2*nhid,),
                                   w2:(2*nhid, nhid),  b2:(nhid,)
    returns (B, N, nhid) float32
    """
    w1, b1, w2, b2 = params
    B, N, F = x.shape
    H1 = w1.shape[1]
    H2 = w2.shape[1]

    # Lane-dense padded output width (multiple of 128) -> unmasked stores.
    Hp = max(128, ((H2 + 127) // 128) * 128)

    # Weights/biases pre-cast (and zero-padded) once; they are grid-invariant
    # blocks so they are DMA'd a single time per kernel launch.
    # TODO(synk): in an inference loop, hoist these conversions out of the
    # per-call wrapper entirely.
    w1b = w1.astype(jnp.bfloat16)
    w2p = jnp.pad(w2, ((0, 0), (0, Hp - H2))) if Hp != H2 else w2
    w2b = w2p.astype(jnp.bfloat16)
    b1r = b1.reshape(1, H1).astype(jnp.float32)
    b2p = jnp.pad(b2, (0, Hp - H2)) if Hp != H2 else b2
    b2r = b2p.reshape(1, Hp).astype(jnp.float32)

    GB = _pick_graphs_per_step(B, N)
    steps = B // GB
    reassoc = F < H1
    kernel = make_gpn_encoder_kernel(reassoc)

    grid_spec = pltpu.PrefetchScalarGridSpec(
        num_scalar_prefetch=0,
        grid=(steps,),
        in_specs=[
            pl.BlockSpec((GB, N, F), lambda b: (b, 0, 0)),   # x   (f32)
            pl.BlockSpec((GB, N, N), lambda b: (b, 0, 0)),   # adj (f32)
            pl.BlockSpec((F, H1), lambda b: (0, 0)),         # W1  (bf16, resident)
            pl.BlockSpec((1, H1), lambda b: (0, 0)),         # b1  (f32, resident)
            pl.BlockSpec((H1, Hp), lambda b: (0, 0)),        # W2  (bf16, resident)
            pl.BlockSpec((1, Hp), lambda b: (0, 0)),         # b2  (f32, resident)
        ],
        out_specs=pl.BlockSpec((GB, N, Hp), lambda b: (b, 0, 0)),
    )

    # FLOPs reflect the chosen association for layer 1.
    flops = 2 * B * N * (N * (F if reassoc else H1) + F * H1 + H1 * Hp + N * Hp)
    bytes_accessed = ((x.size + adj.size) * 4
                      + (w1b.size + w2b.size) * 2
                      + (b1r.size + b2r.size) * 4
                      + B * N * Hp * 4)

    # VMEM budget: double-buffered per-step x/adj/out blocks + resident
    # weights, with generous headroom (clamped to v7x-safe 64 MiB).
    blk_bytes = 2 * GB * N * (F + N + Hp) * 4
    wt_bytes = (F * H1 + H1 * Hp) * 2 * 2 + (H1 + Hp) * 4 * 2
    vmem_limit = int(min(64 << 20, max(16 << 20, 4 * (blk_bytes + wt_bytes) + (2 << 20))))

    out = pl.pallas_call(
        kernel,
        out_shape=jax.ShapeDtypeStruct((B, N, Hp), jnp.float32),
        grid_spec=grid_spec,
        compiler_params=pltpu.CompilerParams(
            dimension_semantics=("parallel",),
            vmem_limit_bytes=vmem_limit),
        cost_estimate=pl.CostEstimate(
            flops=int(flops), transcendentals=0,
            bytes_accessed=int(bytes_accessed)),
    )(x.astype(jnp.float32), adj.astype(jnp.float32), w1b, b1r, w2b, b2r)

    return out[..., :H2] if Hp != H2 else out


def init_params(key, nfeat, nhid):
    """Matches GraphConvolution.reset_parameters(): uniform(-stdv, stdv), stdv=1/sqrt(out)."""
    k1, k2, k3, k4 = jax.random.split(key, 4)

    stdv1 = 1.0 / math.sqrt(2 * nhid)
    w1 = jax.random.uniform(k1, (nfeat, 2 * nhid), jnp.float32, -stdv1, stdv1)
    b1 = jax.random.uniform(k2, (2 * nhid,), jnp.float32, -stdv1, stdv1)

    stdv2 = 1.0 / math.sqrt(nhid)
    w2 = jax.random.uniform(k3, (2 * nhid, nhid), jnp.float32, -stdv2, stdv2)
    b2 = jax.random.uniform(k4, (nhid,), jnp.float32, -stdv2, stdv2)

    return w1, b1, w2, b2


def reference_same_plan(x, adj, params):
    """Pure-JAX reference with the identical bf16-operand / f32-accumulate /
    reassociated-layer-1 plan as the kernel (tight comparison)."""
    w1, b1, w2, b2 = params
    xb, ab = x.astype(jnp.bfloat16), adj.astype(jnp.bfloat16)
    w1b, w2b = w1.astype(jnp.bfloat16), w2.astype(jnp.bfloat16)

    if x.shape[-1] < w1.shape[1]:   # reassociated: (adj @ x) @ W1
        ax = jnp.einsum('bnm,bmf->bnf', ab, xb, preferred_element_type=jnp.float32)
        h1 = jnp.einsum('bnf,fh->bnh', ax.astype(jnp.bfloat16), w1b,
                        preferred_element_type=jnp.float32) + b1
    else:
        s1 = jnp.einsum('bnf,fh->bnh', xb, w1b, preferred_element_type=jnp.float32)
        h1 = jnp.einsum('bnm,bmh->bnh', ab, s1.astype(jnp.bfloat16),
                        preferred_element_type=jnp.float32) + b1
    h1 = jnp.maximum(h1, 0.0)

    s2 = jnp.einsum('bnh,hk->bnk', h1.astype(jnp.bfloat16), w2b,
                    preferred_element_type=jnp.float32)
    h2 = jnp.einsum('bnm,bmk->bnk', ab, s2.astype(jnp.bfloat16),
                    preferred_element_type=jnp.float32) + b2
    return h2


def reference_f32(x, adj, params):
    """PyTorch-faithful full-f32 reference (bounds bf16 drift)."""
    w1, b1, w2, b2 = params
    s1 = jnp.einsum('bnf,fh->bnh', x, w1)
    h1 = jnp.maximum(jnp.einsum('bnm,bmh->bnh', adj, s1) + b1, 0.0)
    s2 = jnp.einsum('bnh,hk->bnk', h1, w2)
    return jnp.einsum('bnm,bmk->bnk', adj, s2) + b2


if __name__ == "__main__":
    # 32 graphs, 8 nodes each, 32 input features, nhid=64 (=> 2*nhid = 128).
    # Folding picks GB=16 graphs per step -> M = 128 rows, grid=(2,) parallel.
    B, N, nfeat, nhid = 32, 8, 32, 64

    key = jax.random.PRNGKey(0)
    kx, kadj, kp = jax.random.split(key, 3)

    x = jax.random.normal(kx, (B, N, nfeat), jnp.float32)

    # symmetric row-normalized dense adjacency with self loops, per graph
    a = jax.random.uniform(kadj, (B, N, N), jnp.float32)
    a = (a + jnp.swapaxes(a, -1, -2)) * 0.5 + jnp.eye(N, dtype=jnp.float32)
    adj = a / jnp.sum(a, axis=-1, keepdims=True)

    params = init_params(kp, nfeat, nhid)

    out = jax.block_until_ready(gpn_encoder(x, adj, params))
    assert out.shape == (B, N, nhid)

    ref_bf16 = reference_same_plan(x, adj, params)
    ref_f32 = reference_f32(x, adj, params)

    assert jnp.allclose(out, ref_bf16, atol=1e-2, rtol=1e-2), \
        float(jnp.max(jnp.abs(out - ref_bf16)))
    assert jnp.allclose(out, ref_f32, atol=1e-1, rtol=1e-1), \
        float(jnp.max(jnp.abs(out - ref_f32)))

    print("KERNEL_OK")
</pallas_src>

<mosaic_0001>
module attributes {stable_mosaic.version = 11 : i64} {
  func.func @kernel(%arg0: i32, %arg1: memref<16x8x32xf32, #tpu.memory_space<vmem>>, %arg2: memref<16x8x8xf32, #tpu.memory_space<vmem>>, %arg3: memref<32x128xbf16, #tpu.memory_space<vmem>>, %arg4: memref<1x128xf32, #tpu.memory_space<vmem>>, %arg5: memref<128x128xbf16, #tpu.memory_space<vmem>>, %arg6: memref<1x128xf32, #tpu.memory_space<vmem>>, %arg7: memref<16x8x128xf32, #tpu.memory_space<vmem>>) attributes {dimension_semantics = [#tpu.dimension_semantics<parallel>], iteration_bounds = array<i64: 2>, scalar_prefetch = 0 : i64, scratch_operands = 0 : i64, tpu.core_type = #tpu.core_type<tc>, window_params = [{transform_indices = @transform_0, window_bounds = array<i64: 16, 8, 32>}, {transform_indices = @transform_1, window_bounds = array<i64: 16, 8, 8>}, {pipeline_mode = #tpu.pipeline_mode<synchronous>, transform_indices = @transform_2, window_bounds = array<i64: 32, 128>}, {pipeline_mode = #tpu.pipeline_mode<synchronous>, transform_indices = @transform_3, window_bounds = array<i64: 1, 128>}, {pipeline_mode = #tpu.pipeline_mode<synchronous>, transform_indices = @transform_4, window_bounds = array<i64: 128, 128>}, {pipeline_mode = #tpu.pipeline_mode<synchronous>, transform_indices = @transform_5, window_bounds = array<i64: 1, 128>}, {transform_indices = @transform_6, window_bounds = array<i64: 16, 8, 128>}]} {
    %c0 = arith.constant 0 : index
    %c0_0 = arith.constant 0 : index
    %c0_1 = arith.constant 0 : index
    %0 = vector.load %arg1[%c0, %c0_0, %c0_1] : memref<16x8x32xf32, #tpu.memory_space<vmem>>, vector<16x8x32xf32>
    %1 = arith.truncf %0 : vector<16x8x32xf32> to vector<16x8x32xbf16>
    %c0_2 = arith.constant 0 : index
    %c0_3 = arith.constant 0 : index
    %c0_4 = arith.constant 0 : index
    %2 = vector.load %arg2[%c0_2, %c0_3, %c0_4] : memref<16x8x8xf32, #tpu.memory_space<vmem>>, vector<16x8x8xf32>
    %3 = arith.truncf %2 : vector<16x8x8xf32> to vector<16x8x8xbf16>
    "tpu.trace_start"() <{level = 10 : i32, message = "gnm,gmf->gnf"}> : () -> ()
    %cst = arith.constant dense<0.000000e+00> : vector<16x8x32xf32>
    %4 = tpu.matmul %3, %1, %cst {dimension_numbers = #tpu.dot_dimension_numbers<[2], [1], [1], [2], [0, 0, 0, 1, 1, 2], [0], [0]>} : vector<16x8x8xbf16>, vector<16x8x32xbf16>, vector<16x8x32xf32> -> vector<16x8x32xf32>
    "tpu.trace_stop"() : () -> ()
    %5 = vector.shape_cast %4 : vector<16x8x32xf32> to vector<128x32xf32>
    %6 = arith.truncf %5 : vector<128x32xf32> to vector<128x32xbf16>
    %c0_5 = arith.constant 0 : index
    %c0_6 = arith.constant 0 : index
    %7 = vector.load %arg3[%c0_5, %c0_6] : memref<32x128xbf16, #tpu.memory_space<vmem>>, vector<32x128xbf16>
    %cst_7 = arith.constant dense<0.000000e+00> : vector<128x128xf32>
    %8 = tpu.matmul %6, %7, %cst_7 {dimension_numbers = #tpu.dot_dimension_numbers<[1], [0], [0], [1], [0, 0, 1, 1], [], []>} : vector<128x32xbf16>, vector<32x128xbf16>, vector<128x128xf32> -> vector<128x128xf32>
    %c0_8 = arith.constant 0 : index
    %c0_9 = arith.constant 0 : index
    %9 = vector.load %arg4[%c0_8, %c0_9] : memref<1x128xf32, #tpu.memory_space<vmem>>, vector<1x128xf32>
    %10 = vector.broadcast %9 : vector<1x128xf32> to vector<128x128xf32>
    %11 = arith.addf %8, %10 : vector<128x128xf32>
    %cst_10 = arith.constant 0.000000e+00 : f32
    %12 = vector.broadcast %cst_10 : f32 to vector<128x128xf32>
    %13 = arith.maximumf %11, %12 : vector<128x128xf32>
    %14 = arith.truncf %13 : vector<128x128xf32> to vector<128x128xbf16>
    %c0_11 = arith.constant 0 : index
    %c0_12 = arith.constant 0 : index
    %15 = vector.load %arg5[%c0_11, %c0_12] : memref<128x128xbf16, #tpu.memory_space<vmem>>, vector<128x128xbf16>
    %cst_13 = arith.constant dense<0.000000e+00> : vector<128x128xf32>
    %16 = tpu.matmul %14, %15, %cst_13 {dimension_numbers = #tpu.dot_dimension_numbers<[1], [0], [0], [1], [0, 0, 1, 1], [], []>} : vector<128x128xbf16>, vector<128x128xbf16>, vector<128x128xf32> -> vector<128x128xf32>
    %17 = vector.shape_cast %16 : vector<128x128xf32> to vector<16x8x128xf32>
    %18 = arith.truncf %17 : vector<16x8x128xf32> to vector<16x8x128xbf16>
    "tpu.trace_start"() <{level = 10 : i32, message = "gnm,gmh->gnh"}> : () -> ()
    %cst_14 = arith.constant dense<0.000000e+00> : vector<16x8x128xf32>
    %19 = tpu.matmul %3, %18, %cst_14 {dimension_numbers = #tpu.dot_dimension_numbers<[2], [1], [1], [2], [0, 0, 0, 1, 1, 2], [0], [0]>} : vector<16x8x8xbf16>, vector<16x8x128xbf16>, vector<16x8x128xf32> -> vector<16x8x128xf32>
    "tpu.trace_stop"() : () -> ()
    %c0_15 = arith.constant 0 : index
    %c0_16 = arith.constant 0 : index
    %20 = vector.load %arg6[%c0_15, %c0_16] : memref<1x128xf32, #tpu.memory_space<vmem>>, vector<1x128xf32>
    %21 = vector.shape_cast %20 : vector<1x128xf32> to vector<1x1x128xf32>
    %22 = vector.broadcast %21 : vector<1x1x128xf32> to vector<16x8x128xf32>
    %23 = arith.addf %19, %22 : vector<16x8x128xf32>
    %c0_17 = arith.constant 0 : index
    %c0_18 = arith.constant 0 : index
    %c0_19 = arith.constant 0 : index
    %24 = vector.load %arg7[%c0_17, %c0_18, %c0_19] : memref<16x8x128xf32, #tpu.memory_space<vmem>>, vector<16x8x128xf32>
    tpu.vector_store %arg7[%c0_17, %c0_18, %c0_19], %23 {strides = array<i32>} : memref<16x8x128xf32, #tpu.memory_space<vmem>>, vector<16x8x128xf32>,
    return
  }
  func.func @transform_0(%arg0: i32) -> (i32, i32, i32) {
    %c0_i32 = arith.constant 0 : i32
    %c0_i32_0 = arith.constant 0 : i32
    %c0_i32_1 = arith.constant 0 : i32
    return %arg0, %c0_i32, %c0_i32_0 : i32, i32, i32
  }
  func.func @transform_1(%arg0: i32) -> (i32, i32, i32) {
    %c0_i32 = arith.constant 0 : i32
    %c0_i32_0 = arith.constant 0 : i32
    %c0_i32_1 = arith.constant 0 : i32
    return %arg0, %c0_i32, %c0_i32_0 : i32, i32, i32
  }
  func.func @transform_2(%arg0: i32) -> (i32, i32) {
    %c0_i32 = arith.constant 0 : i32
    %c0_i32_0 = arith.constant 0 : i32
    %c0_i32_1 = arith.constant 0 : i32
    return %c0_i32, %c0_i32_0 : i32, i32
  }
  func.func @transform_3(%arg0: i32) -> (i32, i32) {
    %c0_i32 = arith.constant 0 : i32
    %c0_i32_0 = arith.constant 0 : i32
    %c0_i32_1 = arith.constant 0 : i32
    return %c0_i32, %c0_i32_0 : i32, i32
  }
  func.func @transform_4(%arg0: i32) -> (i32, i32) {
    %c0_i32 = arith.constant 0 : i32
    %c0_i32_0 = arith.constant 0 : i32
    %c0_i32_1 = arith.constant 0 : i32
    return %c0_i32, %c0_i32_0 : i32, i32
  }
  func.func @transform_5(%arg0: i32) -> (i32, i32) {
    %c0_i32 = arith.constant 0 : i32
    %c0_i32_0 = arith.constant 0 : i32
    %c0_i32_1 = arith.constant 0 : i32
    return %c0_i32, %c0_i32_0 : i32, i32
  }
  func.func @transform_6(%arg0: i32) -> (i32, i32, i32) {
    %c0_i32 = arith.constant 0 : i32
    %c0_i32_0 = arith.constant 0 : i32
    %c0_i32_1 = arith.constant 0 : i32
    return %arg0, %c0_i32, %c0_i32_0 : i32, i32, i32
  }
}

</mosaic_0001>

<bundles_post_ra>
// kernel: tpu_custom_call.1
= control target key start
LH: loop header
LB: loop body
LE: loop exit
PB: predicated region body
PF: predicated region fallthrough
CT: control target
= control target key end

     0   :  { %11 = vsyncpa [#allocation3], 0  ;;  %s3345_s0 = inlined_call_operand.vmem [shape: f32[32,8,32], index: 0, kind: input, shape index: {}]   ;;  %s3346_s1 = inlined_call_operand.vmem [shape: f32[32,8,8], index: 1, kind: input, shape index: {}]   ;;  %s3347_s2 = inlined_call_operand.hbm [shape: bf16[32,128], index: 2, kind: input, shape index: {}]   ;;  %s3348_s3 = inlined_call_operand.vmem [shape: f32[1,128], index: 3, kind: input, shape index: {}]   ;;  %s3349_s4 = inlined_call_operand.vmem [shape: bf16[128,128], index: 4, kind: input, shape index: {}]   ;;  %s3350_s5 = inlined_call_operand.vmem [shape: f32[1,128], index: 5, kind: input, shape index: {}]   ;;  %s3351_s6 = inlined_call_operand.hbm [shape: f32[32,8,128], index: 6, kind: output, shape index: {}]  }
   0x1   :  { %12 = vsyncpa [#allocation4], 0 }
   0x2   :  { %14 = vsyncpa [#allocation4 + $0x1], 0  ;;  %s2866_s21 = smov 0   ;;  %s2868_s22 = smov 0  }
   0x3   :  { %s2870_s23 = smov 0   ;;  %s2872_s24 = smov 0  }
   0x4 LB: > { %s2887_s25 = sadd.s32 4294967295, %s2821_s24   ;;  %s2258_s26 = sadd.s32 4294967294, %s2821_s24   ;;  %s2821_s24 = sphi %s2872_s24, %s3367_s24   ;;  %s2817_s23 = sphi %s2870_s23, %s3366_s23   ;;  %s2813_s22 = sphi %s2868_s22, %s3365_s22   ;;  %s2809_s21 = sphi %s2866_s21, %s3364_s21  }
   0x5   : > { %s2891_s27 = sadd.s32 1, %s2821_s24   ;;  %s163_s28 = sadd.s32 1, %s2817_s23 }
   0x6   : > { %s160_s29 = ssub.s32 %s2821_s24, %s2891_s27  ;;  %p173_p0 = scmp.ne.s32.totalorder %s2817_s23, %s2813_s22 }
   0x7   : > { %p161_p1 = scmp.eq.s32.totalorder %s160_s29, 0  ;;  %p174_p2 = scmp.eq.s32.totalorder %s2887_s25, 1 }
   0x8   : > { %p179_p3 = scmp.ne.s32.totalorder %s2813_s22, %s2809_s21  ;;  %p180_p4 = scmp.eq.s32.totalorder %s2258_s26, 1 }
   0x9   : > { %s2902_s30 = scalar_select %p161_p1, %s2817_s23, %s163_s28  }
   0xa   : > { %p2904_p5 = por %p174_p2, %p173_p0  ;;  %p2908_p6 = por %p180_p4, %p179_p3 }
   0xb   : > { %p2259_p7 = scmp.ge.s32.totalorder %s2821_s24, 1  ;;  %p187_p8 = scmp.lt.s32.totalorder %s2821_s24, 3 }
   0xc   : > { %s3355_s7 = scalar_select %p2904_p5, 1, 0 }
   0xd   : > { %s3356_s8 = scalar_select %p2908_p6, 1, 0 }
   0xe   : > { %p3352_p9 = scmp.eq.s32.totalorder %s2887_s25, 0  ;;  %p2915_p10 = pnand %p2259_p7, %p187_p8 }
   0xf   : > { %s2823_s10 = smov [#allocation2]   ;;  %s2727_s15 = scalar_lea.hbm %s3347_s2, 256 }
  0x10   : > { %s3357_s9 = scalar_select %p2915_p10, 1, 0 }
  0x11   : > { %s199_s11 = sshll.u32 %s2823_s10, 4  ;;  %p2667_p11 = pneg %p2915_p10  ;;  %s200_s11 = int_to_ptr.vmem [resolvable:$true] %s199_s11 }
  0x12   : > { %p2728_p13 = scmp.ne.s32.totalorder %s3347_s2, %s2727_s15  ;;  %p2734_p3 = scmp.lt.u32.totalorder %s2727_s15, %s3347_s2 }
  0x13   : > { %p2923_p12 = pnand %p3352_p9, %p2667_p11 }
  0x15   : > { %p2729_p0 = pneg %p2923_p12 }
  0x17   : > { %p2730_p1 = pnand %p2729_p0, %p2728_p13 }
  0x19   : > { %p2731_p2 = pneg %p2730_p1 }
  0x1b   : > { %p2736_p4 = pnand %p2734_p3, %p2731_p2 }
  0x1d   : > { %2739 = shalt.err (!%p2736_p4)
}
  0x1e   : > { %s2740_s20 = scalar_lea.vmem %s200_s11, 256  ;;  %p2748_p9 = scmp.lt.s32.totalorder %s200_s11, %s200_s11 }
  0x1f   : > { %p2741_p7 = scmp.ne.s32.totalorder %s200_s11, %s2740_s20  ;;  %p2749_p6 = scmp.lt.s32.totalorder %s2740_s20, %s2740_s20 }
  0x21   : > { %p2743_p8 = pnand %p2741_p7, %p2729_p0  ;;  %p2750_p5 = por %p2749_p6, %p2748_p9 }
  0x23   : > { %p2744_p11 = pneg %p2743_p8 }
  0x25   : > { %p2751_p10 = pnand %p2750_p5, %p2744_p11 }
  0x27   : > { %2754 = shalt.err (!%p2751_p10)
}
  0x28   : > { %s2824_s26 = smov 64   ;;  %s2825_s28 = smov 4  }
  0x29   : > { %2670 = dma.hbm_to_vmem [thread:$0]  (!%p2923_p12), %s3347_s2, 256, %s200_s11, [#allocation3], %s2824_s26, %s2824_s26, %s2825_s28  }
  0x2a   : > { %p3359_p13 = scmp.ne.s32.totalorder %s3357_s9, 0 }
  0x2b   : > { %p3360_p1 = scmp.eq.s32.totalorder (!%p3359_p13), %s2887_s25, 0 }
  0x2c   : > { %242 = sbr.rel (%p3359_p13) target bundleno = 1029 (0x405), region = 44 }
  0x33   : > { %2800 = dma.done.wait (%p3360_p1), [#allocation3], 256   ;;  %p3361_p0 = pmov %p3360_p1 }
  0x34   : > { %s2265_s13 = sshll.u32 %s2887_s25, 4  ;;  %v2826_v0 = vmov 0.0   ;;  %vm2827_vm0 = vmmov 0   ;;  %vm359_vm1 = vcmask 1043456   ;;  %vm355_vm2 = vcmask 64512   ;;  %s274_s26 = sand.u32 1, %s2813_s22  }
  0x35   : > { %2802 = vsyncadd (%p3361_p0), [#allocation3], 4294967040  ;;  %2417 = vmatprep.subr.bf16.mxu0 %v2826_v0  ;;  %2423 = vmatprep.subr.bf16.mxu1 %v2826_v0  ;;  %p278_p5 = scmp.lt.s32.totalorder %s2265_s13, 31  ;;  %vm1124_vm3 = vcmask 261120   ;;  %s2264_s28 = sshll.u32 %s274_s26, 7 }
  0x36   : > { %2419 = vmatprep.mubr.msk.bf16.mxu0 %vm2827_vm0, %v2826_v0  ;;  %2425 = vmatprep.mubr.msk.bf16.mxu1 %vm2827_vm0, %v2826_v0  ;;  %p3362_p9 = scmp.ne.s32.totalorder %s3355_s7, 0 }
  0x37   : > { %s3369_s13 = smov (!%p278_p5, %s2265_s13), 31 }
  0x38   : > { %s2266_s9 = sshll.u32 %s3369_s13, 3  ;;  %s3260_s13 = scalar_lea.vmem [#allocation5], %s2264_s28 }
  0x39   : > { %s2959_s14 = scalar_lea.vmem %s3345_s0, %s2266_s9  ;;  %s2964_s17 = scalar_lea.vmem %s3346_s1, %s2266_s9 }
  0x3a   : > { %v291_v1 = vld [vmem:[%s2959_s14] sm:$0xff]  ;;  %v292_v2 = vld [vmem:[%s2959_s14 + $0x8] sm:$0xff]  ;;  %v293_v7 = vld [vmem:[%s2959_s14 + $0x10] sm:$0xff]  ;;  %s2326_s9 = sshll.u32 %s2887_s25, 11  ;;  %s2172_s11 = sshll.u32 %s3260_s13, 4  ;;  %s3298_s11 = int_to_ptr.vmem [resolvable:$true] %s2172_s11 }
  0x3b   : > { %v323_v3 = vld [vmem:[%s2964_s17] sm:$0xff]  ;;  %v307_v4 = vpack.c.bf16 %v291_v1, %v291_v1  ;;  %v308_v5 = vpack.c.bf16 %v292_v2, %v292_v2  ;;  %v324_v6 = vld [vmem:[%s2964_s17 + $0x8] sm:$0xff]  ;;  %v294_v8 = vld [vmem:[%s2959_s14 + $0x18] sm:$0xff]  ;;  %v309_v9 = vpack.c.bf16 %v293_v7, %v293_v7  ;;  %s3296_s15 = scalar_lea.hbm %s3351_s6, %s2326_s9  ;;  %s3304_s25 = scalar_lea.sflag [#allocation4], %s274_s26 }
  0x3c   : > { %v310_v10 = vpack.c.bf16 %v294_v8, %v294_v8  ;;  %v2974_v13 = vpack.c.bf16 %v323_v3, %v323_v3  ;;  %v2976_v14 = vpack.c.bf16 %v324_v6, %v324_v6  ;;  %v295_v17 = vld [vmem:[%s2959_s14 + $0x20] sm:$0xff]  ;;  %v296_v18 = vld [vmem:[%s2959_s14 + $0x28] sm:$0xff]  ;;  %v325_v19 = vld [vmem:[%s2964_s17 + $0x10] sm:$0xff]  ;;  %s2755_s16 = scalar_lea.vmem %s3298_s11, 2048 }
  0x3d   : > { %v361_v11 = vsel %vm359_vm1, %v307_v4, 0  ;;  %v407_v12 = vsel %vm359_vm1, %v308_v5, 0  ;;  %v453_v15 = vsel %vm359_vm1, %v309_v9, 0  ;;  %v326_v20 = vld [vmem:[%s2964_s17 + $0x18] sm:$0xff]  ;;  %v311_v21 = vpack.c.bf16 %v295_v17, %v295_v17  ;;  %v297_v25 = vld [vmem:[%s2959_s14 + $0x30] sm:$0xff]  ;;  %v327_v28 = vld [vmem:[%s2964_s17 + $0x20] sm:$0xff]  ;;  %p2756_p6 = scmp.ne.s32.totalorder %s3298_s11, %s2755_s16 }
  0x3e   : > { %2418 = vmatpush3.bf16.msra.mxu0 %v361_v11  ;;  %2424 = vmatpush3.bf16.msra.mxu1 %v407_v12  ;;  %v499_v16 = vsel %vm359_vm1, %v310_v10, 0  ;;  %v312_v22 = vpack.c.bf16 %v296_v18, %v296_v18  ;;  %v2996_v23 = vpack.c.bf16 %v325_v19, %v325_v19  ;;  %v2998_v24 = vpack.c.bf16 %v326_v20, %v326_v20  ;;  %v328_v29 = vld [vmem:[%s2964_s17 + $0x28] sm:$0xff]  ;;  %v298_v30 = vld [vmem:[%s2959_s14 + $0x38] sm:$0xff]  ;;  %v299_v37 = vld [vmem:[%s2959_s14 + $0x40] sm:$0xff] }
  0x3f   : > { %2429 = vmatprep.subr.bf16.mxu0 %v2826_v0  ;;  %2435 = vmatprep.subr.bf16.mxu1 %v2826_v0  ;;  %v545_v26 = vsel %vm359_vm1, %v311_v21, 0  ;;  %v313_v31 = vpack.c.bf16 %v297_v25, %v297_v25  ;;  %v314_v32 = vpack.c.bf16 %v298_v30, %v298_v30  ;;  %v3016_v33 = vpack.c.bf16 %v327_v28, %v327_v28  ;;  %v300_v38 = vld [vmem:[%s2959_s14 + $0x48] sm:$0xff]  ;;  %v329_v39 = vld [vmem:[%s2964_s17 + $0x30] sm:$0xff]  ;;  %v330_v40 = vld [vmem:[%s2964_s17 + $0x38] sm:$0xff]  ;;  %p2757_p10 = pnand %p2756_p6, %p3362_p9 }
  0x40   : > { %v591_v27 = vsel %vm359_vm1, %v312_v22, 0  ;;  %v3018_v34 = vpack.c.bf16 %v328_v29, %v328_v29  ;;  %v315_v41 = vpack.c.bf16 %v299_v37, %v299_v37  ;;  %v316_v42 = vpack.c.bf16 %v300_v38, %v300_v38  ;;  %v301_v47 = vld [vmem:[%s2959_s14 + $0x50] sm:$0xff]  ;;  %v302_v48 = vld [vmem:[%s2959_s14 + $0x58] sm:$0xff]  ;;  %v331_v49 = vld [vmem:[%s2964_s17 + $0x40] sm:$0xff] }
  0x41   : > { %2420 = vmatmul.mubr.msk.bf16.vlgmr.msra.gmra.mrb[0].mxu0 %vm355_vm2, %v2974_v13  ;;  %2426 = vmatmul.mubr.msk.bf16.vlgmr.msra.gmra.mrb[0].mxu1 %vm355_vm2, %v2976_v14  ;;  %v637_v35 = vsel %vm359_vm1, %v313_v31, 0  ;;  %v683_v36 = vsel %vm359_vm1, %v314_v32, 0  ;;  %v3036_v43 = vpack.c.bf16 %v329_v39, %v329_v39  ;;  %v3038_v44 = vpack.c.bf16 %v330_v40, %v330_v40  ;;  %v332_v50 = vld [vmem:[%s2964_s17 + $0x48] sm:$0xff]  ;;  %v303_v57 = vld [vmem:[%s2959_s14 + $0x60] sm:$0xff]  ;;  %v333_v59 = vld [vmem:[%s2964_s17 + $0x50] sm:$0xff]  ;;  %p2758_p12 = pneg %p2757_p10 }
  0x42   : > { %2430 = vmatpush3.bf16.msra.mxu0 %v453_v15  ;;  %2436 = vmatpush3.bf16.msra.mxu1 %v499_v16  ;;  %v729_v45 = vsel %vm359_vm1, %v315_v41, 0  ;;  %v775_v46 = vsel %vm359_vm1, %v316_v42, 0  ;;  %v317_v51 = vpack.c.bf16 %v301_v47, %v301_v47  ;;  %v318_v52 = vpack.c.bf16 %v302_v48, %v302_v48  ;;  %v304_v58 = vld [vmem:[%s2959_s14 + $0x68] sm:$0xff]  ;;  %v334_v60 = vld [vmem:[%s2964_s17 + $0x58] sm:$0xff]  ;;  %v305_v4 = vld [vmem:[%s2959_s14 + $0x70] sm:$0xff] }
  0x43   : > { %2431 = vmatprep.mubr.msk.bf16.mxu0 %vm2827_vm0, %v2826_v0  ;;  %2437 = vmatprep.mubr.msk.bf16.mxu1 %vm2827_vm0, %v2826_v0  ;;  %v3056_v53 = vpack.c.bf16 %v331_v49, %v331_v49  ;;  %v3058_v54 = vpack.c.bf16 %v332_v50, %v332_v50  ;;  %v319_v61 = vpack.c.bf16 %v303_v57, %v303_v57  ;;  %v306_v5 = vld [vmem:[%s2959_s14 + $0x78] sm:$0xff]  ;;  %v335_v6 = vld [vmem:[%s2964_s17 + $0x60] sm:$0xff]  ;;  %v336_v7 = vld [vmem:[%s2964_s17 + $0x68] sm:$0xff] }
  0x44   : > { %2441 = vmatprep.subr.bf16.mxu0 %v2826_v0  ;;  %2447 = vmatprep.subr.bf16.mxu1 %v2826_v0  ;;  %v821_v55 = vsel %vm359_vm1, %v317_v51, 0  ;;  %v867_v56 = vsel %vm359_vm1, %v318_v52, 0  ;;  %v320_v62 = vpack.c.bf16 %v304_v58, %v304_v58  ;;  %v3076_v63 = vpack.c.bf16 %v333_v59, %v333_v59  ;;  %v337_v16 = vld [vmem:[%s2964_s17 + $0x70] sm:$0xff]  ;;  %v338_v17 = vld [vmem:[%s2964_s17 + $0x78] sm:$0xff]  ;;  %v2717_v20 = vld [vmem:[#allocation2] sm:$0xff]   ;;  %s2828_s17 = smov [#allocation5]  }
  0x45   : > { %v3078_v1 = vpack.c.bf16 %v334_v60, %v334_v60  ;;  %v913_v2 = vsel %vm359_vm1, %v319_v61, 0  ;;  %v321_v8 = vpack.c.bf16 %v305_v4, %v305_v4  ;;  %v322_v9 = vpack.c.bf16 %v306_v5, %v306_v5  ;;  %v2718_v21 = vld [vmem:[#allocation2 + $0x8] sm:$0xff]   ;;  %v2719_v22 = vld [vmem:[%s3349_s4] sm:$0xff]   ;;  %s2759_s18 = sshll.u32 %s2828_s17, 4  ;;  %s2760_s18 = int_to_ptr.vmem [resolvable:$false] %s2759_s18 }
  0x46   : > { %v959_v3 = vsel %vm359_vm1, %v320_v62, 0  ;;  %v3096_v10 = vpack.c.bf16 %v335_v6, %v335_v6  ;;  %v3098_v11 = vpack.c.bf16 %v336_v7, %v336_v7  ;;  %v3112_v18 = vpack.c.bf16 %v337_v16, %v337_v16  ;;  %v2720_v25 = vld [vmem:[%s3349_s4 + $0x8] sm:$0xff]   ;;  %v2723_v28 = vld [vmem:[%s3349_s4 + $0x20] sm:$0xff]   ;;  %s2761_s19 = scalar_lea.vmem %s2760_s18, 4096  ;;  %p2762_p2 = scmp.lt.s32.totalorder %s3298_s11, %s2760_s18 }
  0x47   : > { %v1005_v12 = vsel %vm359_vm1, %v321_v8, 0  ;;  %v1051_v15 = vsel %vm359_vm1, %v322_v9, 0  ;;  %v3114_v19 = vpack.c.bf16 %v338_v17, %v338_v17  ;;  %v2724_v29 = vld [vmem:[%s3349_s4 + $0x28] sm:$0xff]   ;;  %p2763_p3 = scmp.lt.s32.totalorder %s2761_s19, %s2755_s16 }
  0x49   : > { %2432 = vmatmul.mubr.msk.bf16.vlgmr.msra.gmra.mrb[4].mxu0 %vm355_vm2, %v2996_v23  ;;  %2438 = vmatmul.mubr.msk.bf16.vlgmr.msra.gmra.mrb[4].mxu1 %vm355_vm2, %v2998_v24  ;;  %p2764_p4 = por %p2763_p3, %p2762_p2 }
  0x4a   : > { %2442 = vmatpush3.bf16.msra.mxu0 %v545_v26  ;;  %2448 = vmatpush3.bf16.msra.mxu1 %v591_v27  ;;  %v2721_v26 = vld [vmem:[%s3349_s4 + $0x10] sm:$0xff]   ;;  %v2722_v27 = vld [vmem:[%s3349_s4 + $0x18] sm:$0xff]  }
  0x4b   : > { %2443 = vmatprep.mubr.msk.bf16.mxu0 %vm2827_vm0, %v2826_v0  ;;  %2449 = vmatprep.mubr.msk.bf16.mxu1 %vm2827_vm0, %v2826_v0  ;;  %p2765_p7 = pnand %p2764_p4, %p2758_p12 }
  0x4c   : > { %2453 = vmatprep.subr.bf16.mxu0 %v2826_v0  ;;  %2459 = vmatprep.subr.bf16.mxu1 %v2826_v0 }
  0x51   : > { %2444 = vmatmul.mubr.msk.bf16.vlgmr.msra.gmra.mrb[8].mxu0 %vm355_vm2, %v3016_v33  ;;  %2450 = vmatmul.mubr.msk.bf16.vlgmr.msra.gmra.mrb[8].mxu1 %vm355_vm2, %v3018_v34 }
  0x52   : > { %2454 = vmatpush3.bf16.msra.mxu0 %v637_v35  ;;  %2460 = vmatpush3.bf16.msra.mxu1 %v683_v36 }
  0x53   : > { %2455 = vmatprep.mubr.msk.bf16.mxu0 %vm2827_vm0, %v2826_v0  ;;  %2461 = vmatprep.mubr.msk.bf16.mxu1 %vm2827_vm0, %v2826_v0 }
  0x54   : > { %2465 = vmatprep.subr.bf16.mxu0 %v2826_v0  ;;  %2471 = vmatprep.subr.bf16.mxu1 %v2826_v0 }
  0x59   : > { %2456 = vmatmul.mubr.msk.bf16.vlgmr.msra.gmra.mrb[12].mxu0 %vm355_vm2, %v3036_v43  ;;  %2462 = vmatmul.mubr.msk.bf16.vlgmr.msra.gmra.mrb[12].mxu1 %vm355_vm2, %v3038_v44 }
  0x5a   : > { %2466 = vmatpush3.bf16.msra.mxu0 %v729_v45  ;;  %2472 = vmatpush3.bf16.msra.mxu1 %v775_v46 }
  0x5b   : > { %2467 = vmatprep.mubr.msk.bf16.mxu0 %vm2827_vm0, %v2826_v0  ;;  %2473 = vmatprep.mubr.msk.bf16.mxu1 %vm2827_vm0, %v2826_v0 }
  0x5c   : > { %2477 = vmatprep.subr.bf16.mxu0 %v2826_v0  ;;  %2483 = vmatprep.subr.bf16.mxu1 %v2826_v0 }
  0x61   : > { %2468 = vmatmul.mubr.msk.bf16.vlgmr.msra.gmra.mrb[16].mxu0 %vm355_vm2, %v3056_v53  ;;  %2474 = vmatmul.mubr.msk.bf16.vlgmr.msra.gmra.mrb[16].mxu1 %vm355_vm2, %v3058_v54 }
  0x62   : > { %2478 = vmatpush3.bf16.msra.mxu0 %v821_v55  ;;  %2484 = vmatpush3.bf16.msra.mxu1 %v867_v56 }
  0x63   : > { %2479 = vmatprep.mubr.msk.bf16.mxu0 %vm2827_vm0, %v2826_v0  ;;  %2485 = vmatprep.mubr.msk.bf16.mxu1 %vm2827_vm0, %v2826_v0 }
  0x64   : > { %2489 = vmatprep.subr.bf16.mxu0 %v2826_v0  ;;  %2495 = vmatprep.subr.bf16.mxu1 %v2826_v0 }
  0x69   : > { %2480 = vmatmul.mubr.msk.bf16.vlgmr.msra.gmra.mrb[20].mxu0 %vm355_vm2, %v3076_v63  ;;  %2486 = vmatmul.mubr.msk.bf16.vlgmr.msra.gmra.mrb[20].mxu1 %vm355_vm2, %v3078_v1 }
  0x6a   : > { %2490 = vmatpush3.bf16.msra.mxu0 %v913_v2  ;;  %2496 = vmatpush3.bf16.msra.mxu1 %v959_v3 }
  0x6b   : > { %2491 = vmatprep.mubr.msk.bf16.mxu0 %vm2827_vm0, %v2826_v0  ;;  %2497 = vmatprep.mubr.msk.bf16.mxu1 %vm2827_vm0, %v2826_v0 }
  0x6c   : > { %2501 = vmatprep.subr.bf16.mxu0 %v2826_v0  ;;  %2507 = vmatprep.subr.bf16.mxu1 %v2826_v0 }
  0x71   : > { %2492 = vmatmul.mubr.msk.bf16.vlgmr.msra.gmra.mrb[24].mxu0 %vm355_vm2, %v3096_v10  ;;  %2498 = vmatmul.mubr.msk.bf16.vlgmr.msra.gmra.mrb[24].mxu1 %vm355_vm2, %v3098_v11 }
  0x72   : > { %2502 = vmatpush3.bf16.msra.mxu0 %v1005_v12  ;;  %2508 = vmatpush3.bf16.msra.mxu1 %v1051_v15 }
  0x73   : > { %2503 = vmatprep.mubr.msk.bf16.mxu0 %vm2827_vm0, %v2826_v0  ;;  %2509 = vmatprep.mubr.msk.bf16.mxu1 %vm2827_vm0, %v2826_v0 }
  0x74   : > { %2513 = vmatprep.subr.bf16.mxu0 %v2717_v20  ;;  %2533 = vmatprep.subr.bf16.mxu1 %v2719_v22 }
  0x79   : > { %2504 = vmatmul.mubr.msk.bf16.vlgmr.msra.gmra.mrb[28].mxu0 %vm355_vm2, %v3112_v18  ;;  %2510 = vmatmul.mubr.msk.bf16.vlgmr.msra.gmra.mrb[28].mxu1 %vm355_vm2, %v3114_v19 }
  0x7a   : > { %2514 = vmatpush3.bf16.msra.mxu0 %v2717_v20  ;;  %2534 = vmatpush3.bf16.msra.mxu1 %v2719_v22 }
  0x7b   : > { %2515 = vmatprep.subr.bf16.mxu0 %v2718_v21  ;;  %2535 = vmatprep.subr.bf16.mxu1 %v2720_v25 }
  0x7e   : > { %2516 = vmatpush3.bf16.msra.mxu0 %v2718_v21  ;;  %2536 = vmatpush3.bf16.msra.mxu1 %v2720_v25 }
  0x7f   : > { %2565 = vmatprep.subr.bf16.mxu0 %v2826_v0  ;;  %2537 = vmatprep.subr.bf16.mxu1 %v2721_v26 }
  0x82   : > { %2538 = vmatpush3.bf16.msra.mxu1 %v2721_v26 }
  0x83   : > { %2539 = vmatprep.subr.bf16.mxu1 %v2722_v27 }
  0x86   : > { %2540 = vmatpush3.bf16.msra.mxu1 %v2722_v27 }
  0x87   : > { %2541 = vmatprep.subr.bf16.mxu1 %v2723_v28 }
  0x8a   : > { %2542 = vmatpush3.bf16.msra.mxu1 %v2723_v28 }
  0x8b   : > { %2543 = vmatprep.subr.bf16.mxu1 %v2724_v29 }
  0x8e   : > { %2544 = vmatpush3.bf16.msra.mxu1 %v2724_v29 }
 0x114   : > { %v397_v30 = vpop.f32.mrb[0].mxu0  ;;  %v443_v31 = vpop.f32.mrb[0].mxu1 }
 0x115   : > { %v1093_v32 = vpack.c.bf16 %v443_v31, %v397_v30  ;;  %v2421_v35 = vpop.f32.mrb[1].mxu0  ;;  %v2427_v36 = vpop.f32.mrb[1].mxu1 }
 0x116   : > { %v400_v37 = vpop.f32.mrb[2].mxu0  ;;  %v446_v38 = vpop.f32.mrb[2].mxu1 }
 0x117   : > { %v2422_v39 = vpop.f32.mrb[3].mxu0  ;;  %v2428_v40 = vpop.f32.mrb[3].mxu1  ;;  %2517 = vmatprep.mubr.msk.bf16.mxu0 %vm1124_vm3, %v1093_v32 }
 0x11c   : > { %v489_v41 = vpop.f32.mrb[4].mxu0  ;;  %v535_v42 = vpop.f32.mrb[4].mxu1 }
 0x11d   : > { %v1094_v45 = vpack.c.bf16 %v535_v42, %v489_v41  ;;  %v2433_v46 = vpop.f32.mrb[5].mxu0  ;;  %v2439_v47 = vpop.f32.mrb[5].mxu1 }
 0x11e   : > { %v492_v48 = vpop.f32.mrb[6].mxu0  ;;  %v538_v49 = vpop.f32.mrb[6].mxu1 }
 0x11f   : > { %v2434_v50 = vpop.f32.mrb[7].mxu0  ;;  %v2440_v51 = vpop.f32.mrb[7].mxu1  ;;  %2518 = vmatmul.mubr.msk.bf16.vlgmr.msra.gmra.mrb[32].mxu0 %vm1124_vm3, %v1094_v45 }
 0x124   : > { %v581_v52 = vpop.f32.mrb[8].mxu0  ;;  %v627_v55 = vpop.f32.mrb[8].mxu1 }
 0x125   : > { %v1095_v56 = vpack.c.bf16 %v627_v55, %v581_v52  ;;  %v2445_v57 = vpop.f32.mrb[9].mxu0  ;;  %v2451_v58 = vpop.f32.mrb[9].mxu1 }
 0x126   : > { %v584_v59 = vpop.f32.mrb[10].mxu0  ;;  %v630_v60 = vpop.f32.mrb[10].mxu1 }
 0x127   : > { %v2446_v61 = vpop.f32.mrb[11].mxu0  ;;  %v2452_v62 = vpop.f32.mrb[11].mxu1  ;;  %2521 = vmatprep.mubr.msk.bf16.mxu0 %vm1124_vm3, %v1095_v56 }
 0x128   : > { %v2725_v61 = vld [vmem:[%s3349_s4 + $0x30] sm:$0xff]   ;;  %v2726_v62 = vld [vmem:[%s3349_s4 + $0x38] sm:$0xff]  }
 0x129   : > { %2545 = vmatprep.subr.bf16.mxu1 %v2725_v61 }
 0x12a   : > { %2546 = vmatpush3.bf16.msra.mxu1 %v2725_v61 }
 0x12b   : > { %2547 = vmatprep.subr.bf16.mxu1 %v2726_v62 }
 0x12c   : > { %v673_v2 = vpop.f32.mrb[12].mxu0  ;;  %v719_v3 = vpop.f32.mrb[12].mxu1 }
 0x12d   : > { %v1096_v4 = vpack.c.bf16 %v719_v3, %v673_v2  ;;  %v2457_v5 = vpop.f32.mrb[13].mxu0  ;;  %v2463_v6 = vpop.f32.mrb[13].mxu1  ;;  %v2285_v2 = vld [vmem:[%s3348_s3] ss:$0 sm:$0xff] }
 0x12e   : > { %v676_v7 = vpop.f32.mrb[14].mxu0  ;;  %v722_v8 = vpop.f32.mrb[14].mxu1  ;;  %2548 = vmatpush3.bf16.msra.mxu1 %v2726_v62 }
 0x12f   : > { %2522 = vmatmul.mubr.msk.bf16.gmra.mrb[36].mxu0 %vm1124_vm3, %v1096_v4  ;;  %v2458_v9 = vpop.f32.mrb[15].mxu0  ;;  %v2464_v12 = vpop.f32.mrb[15].mxu1  ;;  %2589 = vmatprep.subr.bf16.mxu1 %v2826_v0 }
 0x134   : > { %v765_v15 = vpop.f32.mrb[16].mxu0  ;;  %v811_v16 = vpop.f32.mrb[16].mxu1 }
 0x135   : > { %v1097_v17 = vpack.c.bf16 %v811_v16, %v765_v15  ;;  %v2469_v20 = vpop.f32.mrb[17].mxu0  ;;  %v2475_v21 = vpop.f32.mrb[17].mxu1 }
 0x136   : > { %v768_v22 = vpop.f32.mrb[18].mxu0  ;;  %v814_v25 = vpop.f32.mrb[18].mxu1 }
 0x137   : > { %v2470_v26 = vpop.f32.mrb[19].mxu0  ;;  %v2476_v27 = vpop.f32.mrb[19].mxu1  ;;  %2525 = vmatprep.mubr.msk.bf16.mxu0 %vm1124_vm3, %v1097_v17 }
 0x13c   : > { %v857_v28 = vpop.f32.mrb[20].mxu0  ;;  %v903_v29 = vpop.f32.mrb[20].mxu1 }
 0x13d   : > { %v1098_v30 = vpack.c.bf16 %v903_v29, %v857_v28  ;;  %v2481_v31 = vpop.f32.mrb[21].mxu0  ;;  %v2487_v32 = vpop.f32.mrb[21].mxu1 }
 0x13e   : > { %v860_v35 = vpop.f32.mrb[22].mxu0  ;;  %v906_v36 = vpop.f32.mrb[22].mxu1 }
 0x13f   : > { %2526 = vmatmul.mubr.msk.bf16.gmra.mrb[40].mxu0 %vm1124_vm3, %v1098_v30  ;;  %v2482_v37 = vpop.f32.mrb[23].mxu0  ;;  %v2488_v38 = vpop.f32.mrb[23].mxu1 }
 0x144   : > { %v949_v39 = vpop.f32.mrb[24].mxu0  ;;  %v995_v40 = vpop.f32.mrb[24].mxu1 }
 0x145   : > { %v1099_v41 = vpack.c.bf16 %v995_v40, %v949_v39  ;;  %v2493_v42 = vpop.f32.mrb[25].mxu0  ;;  %v2499_v45 = vpop.f32.mrb[25].mxu1 }
 0x146   : > { %v952_v46 = vpop.f32.mrb[26].mxu0  ;;  %v998_v47 = vpop.f32.mrb[26].mxu1 }
 0x147   : > { %v2494_v48 = vpop.f32.mrb[27].mxu0  ;;  %v2500_v49 = vpop.f32.mrb[27].mxu1  ;;  %2529 = vmatprep.mubr.msk.bf16.mxu0 %vm1124_vm3, %v1099_v41 }
 0x14c   : > { %v1041_v50 = vpop.f32.mrb[28].mxu0  ;;  %v1087_v51 = vpop.f32.mrb[28].mxu1 }
 0x14d   : > { %v1100_v52 = vpack.c.bf16 %v1087_v51, %v1041_v50  ;;  %v2505_v55 = vpop.f32.mrb[29].mxu0  ;;  %v2511_v56 = vpop.f32.mrb[29].mxu1 }
 0x14e   : > { %v1044_v57 = vpop.f32.mrb[30].mxu0  ;;  %v1090_v58 = vpop.f32.mrb[30].mxu1 }
 0x14f   : > { %2530 = vmatmul.mubr.msk.bf16.gmra.mrb[44].mxu0 %vm1124_vm3, %v1100_v52  ;;  %v2506_v59 = vpop.f32.mrb[31].mxu0  ;;  %v2512_v60 = vpop.f32.mrb[31].mxu1 }
 0x150   : > { %2567 = vmatprep.mubr.msk.bf16.mxu0 %vm2827_vm0, %v2826_v0 }
 0x1f2   : > { %v2519_v3 = vpop.f32.mrb[32].mxu0 }
 0x1f3   : > { %v1192_v4 = vadd.f32 %v2519_v3, %v2285_v2  ;;  %v1183_v5 = vpop.f32.mrb[33].mxu0 }
 0x1f4   : > { %v1184_v6 = vadd.f32 %v2285_v2, %v1183_v5  ;;  %v2520_v7 = vpop.f32.mrb[34].mxu0 }
 0x1f5   : > { %v1195_v8 = vadd.f32 %v2520_v7, %v2285_v2  ;;  %v1186_v9 = vpop.f32.mrb[35].mxu0  ;;  %v1248_v15 = vmax.f32 %v1192_v4, 0.0 }
 0x1f6   : > { %v1187_v12 = vadd.f32 %v2285_v2, %v1186_v9  ;;  %v1246_v17 = vmax.f32 %v1184_v6, 0.0 }
 0x1f7   : > { %v1249_v16 = vmax.f32 %v1195_v8, 0.0 }
 0x1f8   : > { %v1247_v20 = vmax.f32 %v1187_v12, 0.0 }
 0x1f9   : > { %v1263_v21 = vpack.c.bf16 %v1249_v16, %v1248_v15 }
 0x1fa   : > { %v1262_v22 = vpack.c.bf16 %v1247_v20, %v1246_v17 }
 0x1fc   : > { %2549 = vmatprep.mubr.bf16.mxu1 %v1262_v22 }
 0x1fd   : > { %2550 = vmatmul.mubr.bf16.vlgmr.msra.gmra.mrb[32].mxu1 %v1263_v21 }
 0x202   : > { %v2523_v25 = vpop.f32.mrb[36].mxu0 }
 0x203   : > { %v1208_v26 = vadd.f32 %v2523_v25, %v2285_v2  ;;  %v1199_v27 = vpop.f32.mrb[37].mxu0 }
 0x204   : > { %v1200_v28 = vadd.f32 %v2285_v2, %v1199_v27  ;;  %v2524_v29 = vpop.f32.mrb[38].mxu0 }
 0x205   : > { %v1252_v30 = vmax.f32 %v1208_v26, 0.0  ;;  %v1211_v31 = vadd.f32 %v2524_v29, %v2285_v2  ;;  %v1202_v32 = vpop.f32.mrb[39].mxu0 }
 0x206   : > { %v1250_v35 = vmax.f32 %v1200_v28, 0.0  ;;  %v1203_v36 = vadd.f32 %v2285_v2, %v1202_v32 }
 0x207   : > { %v1253_v37 = vmax.f32 %v1211_v31, 0.0 }
 0x208   : > { %v1251_v38 = vmax.f32 %v1203_v36, 0.0 }
 0x209   : > { %v1265_v39 = vpack.c.bf16 %v1253_v37, %v1252_v30 }
 0x20a   : > { %v1264_v40 = vpack.c.bf16 %v1251_v38, %v1250_v35 }
 0x20c   : > { %2553 = vmatprep.mubr.bf16.mxu1 %v1264_v40 }
 0x20d   : > { %2554 = vmatmul.mubr.bf16.gmra.mrb[36].mxu1 %v1265_v39 }
 0x212   : > { %v2527_v41 = vpop.f32.mrb[40].mxu0 }
 0x213   : > { %v1224_v42 = vadd.f32 %v2527_v41, %v2285_v2  ;;  %v1215_v45 = vpop.f32.mrb[41].mxu0 }
 0x214   : > { %v1216_v46 = vadd.f32 %v2285_v2, %v1215_v45  ;;  %v2528_v47 = vpop.f32.mrb[42].mxu0 }
 0x215   : > { %v1256_v48 = vmax.f32 %v1224_v42, 0.0  ;;  %v1227_v49 = vadd.f32 %v2528_v47, %v2285_v2  ;;  %v1218_v50 = vpop.f32.mrb[43].mxu0 }
 0x216   : > { %v1254_v51 = vmax.f32 %v1216_v46, 0.0  ;;  %v1219_v52 = vadd.f32 %v2285_v2, %v1218_v50 }
 0x217   : > { %v1257_v55 = vmax.f32 %v1227_v49, 0.0 }
 0x218   : > { %v1255_v56 = vmax.f32 %v1219_v52, 0.0 }
 0x219   : > { %v1267_v57 = vpack.c.bf16 %v1257_v55, %v1256_v48 }
 0x21a   : > { %v1266_v58 = vpack.c.bf16 %v1255_v56, %v1254_v51 }
 0x21c   : > { %2557 = vmatprep.mubr.bf16.mxu1 %v1266_v58 }
 0x21d   : > { %2558 = vmatmul.mubr.bf16.gmra.mrb[40].mxu1 %v1267_v57 }
 0x222   : > { %v2531_v59 = vpop.f32.mrb[44].mxu0 }
 0x223   : > { %v1240_v60 = vadd.f32 %v2531_v59, %v2285_v2  ;;  %v1231_v61 = vpop.f32.mrb[45].mxu0 }
 0x224   : > { %v1232_v62 = vadd.f32 %v2285_v2, %v1231_v61  ;;  %v2532_v3 = vpop.f32.mrb[46].mxu0 }
 0x225   : > { %v1260_v4 = vmax.f32 %v1240_v60, 0.0  ;;  %v1243_v5 = vadd.f32 %v2532_v3, %v2285_v2  ;;  %v1234_v6 = vpop.f32.mrb[47].mxu0 }
 0x226   : > { %v1258_v7 = vmax.f32 %v1232_v62, 0.0  ;;  %v1235_v8 = vadd.f32 %v2285_v2, %v1234_v6 }
 0x227   : > { %v1261_v9 = vmax.f32 %v1243_v5, 0.0 }
 0x228   : > { %v1259_v12 = vmax.f32 %v1235_v8, 0.0 }
 0x229   : > { %v1269_v15 = vpack.c.bf16 %v1261_v9, %v1260_v4 }
 0x22a   : > { %v1268_v16 = vpack.c.bf16 %v1259_v12, %v1258_v7 }
 0x22c   : > { %2561 = vmatprep.mubr.bf16.mxu1 %v1268_v16 }
 0x22d   : > { %2562 = vmatmul.mubr.bf16.gmra.mrb[44].mxu1 %v1269_v15 }
 0x22e   : > { %2591 = vmatprep.mubr.msk.bf16.mxu1 %vm2827_vm0, %v2826_v0 }
 0x2d0   : > { %v2551_v17 = vpop.f32.mrb[32].mxu1 }
 0x2d1   : > { %v1368_v20 = vpop.f32.mrb[33].mxu1  ;;  %v1433_v28 = vpack.c.bf16 %v2551_v17, %v2551_v17 }
 0x2d2   : > { %v1431_v21 = vpack.c.bf16 %v1368_v20, %v1368_v20  ;;  %v2552_v22 = vpop.f32.mrb[34].mxu1 }
 0x2d3   : > { %v1371_v25 = vpop.f32.mrb[35].mxu1  ;;  %v1541_v29 = vsel %vm359_vm1, %v1433_v28, 0  ;;  %v1434_v37 = vpack.c.bf16 %v2552_v22, %v2552_v22 }
 0x2d4   : > { %v1455_v26 = vsel %vm359_vm1, %v1431_v21, 0  ;;  %v1432_v27 = vpack.c.bf16 %v1371_v25, %v1371_v25 }
 0x2d5   : > { %2566 = vmatpush3.bf16.msra.mxu0 %v1455_v26  ;;  %v1584_v39 = vsel %vm359_vm1, %v1434_v37, 0 }
 0x2d6   : > { %2571 = vmatprep.subr.bf16.mxu0 %v2826_v0  ;;  %v1498_v2 = vsel %vm359_vm1, %v1432_v27, 0 }
 0x2d8   : > { %2568 = vmatmul.mubr.msk.bf16.vlgmr.msra.gmra.mrb[48].mxu0 %vm355_vm2, %v2974_v13 }
 0x2d9   : > { %2572 = vmatpush3.bf16.msra.mxu0 %v1498_v2  ;;  %2573 = vmatprep.mubr.msk.bf16.mxu0 %vm2827_vm0, %v2826_v0 }
 0x2da   : > { %2577 = vmatprep.subr.bf16.mxu0 %v2826_v0 }
 0x2e0   : > { %2574 = vmatmul.mubr.msk.bf16.vlgmr.msra.gmra.mrb[52].mxu0 %vm355_vm2, %v2976_v14  ;;  %v2555_v30 = vpop.f32.mrb[36].mxu1 }
 0x2e1   : > { %2578 = vmatpush3.bf16.msra.mxu0 %v1541_v29  ;;  %2579 = vmatprep.mubr.msk.bf16.mxu0 %vm2827_vm0, %v2826_v0  ;;  %v1384_v31 = vpop.f32.mrb[37].mxu1  ;;  %v1437_v35 = vpack.c.bf16 %v2555_v30, %v2555_v30 }
 0x2e2   : > { %2583 = vmatprep.subr.bf16.mxu0 %v2826_v0  ;;  %v1435_v13 = vpack.c.bf16 %v1384_v31, %v1384_v31  ;;  %v2556_v32 = vpop.f32.mrb[38].mxu1 }
 0x2e3   : > { %v1387_v36 = vpop.f32.mrb[39].mxu1  ;;  %v1713_v14 = vsel %vm359_vm1, %v1437_v35, 0  ;;  %v1438_v48 = vpack.c.bf16 %v2556_v32, %v2556_v32 }
 0x2e4   : > { %v1627_v38 = vsel %vm359_vm1, %v1435_v13, 0  ;;  %v1436_v40 = vpack.c.bf16 %v1387_v36, %v1387_v36 }
 0x2e5   : > { %2590 = vmatpush3.bf16.msra.mxu1 %v1627_v38  ;;  %v1756_v49 = vsel %vm359_vm1, %v1438_v48, 0 }
 0x2e6   : > { %2601 = vmatprep.subr.bf16.mxu1 %v2826_v0  ;;  %v1670_v41 = vsel %vm359_vm1, %v1436_v40, 0 }
 0x2e8   : > { %2580 = vmatmul.mubr.msk.bf16.vlgmr.msra.gmra.mrb[56].mxu0 %vm355_vm2, %v2996_v23  ;;  %2592 = vmatmul.mubr.msk.bf16.vlgmr.msra.gmra.mrb[48].mxu1 %vm355_vm2, %v3016_v33 }
 0x2e9   : > { %2584 = vmatpush3.bf16.msra.mxu0 %v1584_v39  ;;  %2585 = vmatprep.mubr.msk.bf16.mxu0 %vm2827_vm0, %v2826_v0 }
 0x2ea   : > { %2595 = vmatprep.subr.bf16.mxu0 %v2826_v0  ;;  %2602 = vmatpush3.bf16.msra.mxu1 %v1713_v14 }
 0x2eb   : > { %2603 = vmatprep.mubr.msk.bf16.mxu1 %vm2827_vm0, %v2826_v0  ;;  %2613 = vmatprep.subr.bf16.mxu1 %v2826_v0 }
 0x2f0   : > { %2586 = vmatmul.mubr.msk.bf16.vlgmr.msra.gmra.mrb[60].mxu0 %vm355_vm2, %v2998_v24  ;;  %v2559_v23 = vpop.f32.mrb[40].mxu1  ;;  %2604 = vmatmul.mubr.msk.bf16.vlgmr.msra.gmra.mrb[52].mxu1 %vm355_vm2, %v3036_v43 }
 0x2f1   : > { %2596 = vmatpush3.bf16.msra.mxu0 %v1670_v41  ;;  %2597 = vmatprep.mubr.msk.bf16.mxu0 %vm2827_vm0, %v2826_v0  ;;  %v1400_v33 = vpop.f32.mrb[41].mxu1  ;;  %v1441_v46 = vpack.c.bf16 %v2559_v23, %v2559_v23 }
 0x2f2   : > { %2607 = vmatprep.subr.bf16.mxu0 %v2826_v0  ;;  %v1439_v42 = vpack.c.bf16 %v1400_v33, %v1400_v33  ;;  %v2560_v45 = vpop.f32.mrb[42].mxu1  ;;  %2615 = vmatprep.mubr.msk.bf16.mxu1 %vm2827_vm0, %v2826_v0 }
 0x2f3   : > { %v1403_v47 = vpop.f32.mrb[43].mxu1  ;;  %v1885_v43 = vsel %vm359_vm1, %v1441_v46, 0  ;;  %v1442_v58 = vpack.c.bf16 %v2560_v45, %v2560_v45 }
 0x2f4   : > { %v1799_v24 = vsel %vm359_vm1, %v1439_v42, 0  ;;  %v1440_v50 = vpack.c.bf16 %v1403_v47, %v1403_v47 }
 0x2f5   : > { %2614 = vmatpush3.bf16.msra.mxu1 %v1799_v24  ;;  %v1928_v59 = vsel %vm359_vm1, %v1442_v58, 0 }
 0x2f6   : > { %2625 = vmatprep.subr.bf16.mxu1 %v2826_v0  ;;  %v1842_v51 = vsel %vm359_vm1, %v1440_v50, 0 }
 0x2f8   : > { %2598 = vmatmul.mubr.msk.bf16.vlgmr.msra.gmra.mrb[64].mxu0 %vm355_vm2, %v3018_v34  ;;  %2616 = vmatmul.mubr.msk.bf16.vlgmr.msra.gmra.mrb[56].mxu1 %vm355_vm2, %v3056_v53 }
 0x2f9   : > { %2608 = vmatpush3.bf16.msra.mxu0 %v1756_v49  ;;  %2609 = vmatprep.mubr.msk.bf16.mxu0 %vm2827_vm0, %v2826_v0 }
 0x2fa   : > { %2619 = vmatprep.subr.bf16.mxu0 %v2826_v0  ;;  %2626 = vmatpush3.bf16.msra.mxu1 %v1885_v43 }
 0x2fb   : > { %2627 = vmatprep.mubr.msk.bf16.mxu1 %vm2827_vm0, %v2826_v0  ;;  %2637 = vmatprep.subr.bf16.mxu1 %v2826_v0 }
 0x300   : > { %2610 = vmatmul.mubr.msk.bf16.vlgmr.msra.gmra.mrb[68].mxu0 %vm355_vm2, %v3038_v44  ;;  %v2563_v34 = vpop.f32.mrb[44].mxu1  ;;  %2628 = vmatmul.mubr.msk.bf16.vlgmr.msra.gmra.mrb[60].mxu1 %vm355_vm2, %v3076_v63 }
 0x301   : > { %2620 = vmatpush3.bf16.msra.mxu0 %v1842_v51  ;;  %2621 = vmatprep.mubr.msk.bf16.mxu0 %vm2827_vm0, %v2826_v0  ;;  %v1416_v53 = vpop.f32.mrb[45].mxu1  ;;  %v1445_v56 = vpack.c.bf16 %v2563_v34, %v2563_v34 }
 0x302   : > { %2631 = vmatprep.subr.bf16.mxu0 %v2826_v0  ;;  %v1443_v52 = vpack.c.bf16 %v1416_v53, %v1416_v53  ;;  %v2564_v55 = vpop.f32.mrb[46].mxu1  ;;  %2639 = vmatprep.mubr.msk.bf16.mxu1 %vm2827_vm0, %v2826_v0 }
 0x303   : > { %v1419_v57 = vpop.f32.mrb[47].mxu1  ;;  %v2057_v63 = vsel %vm359_vm1, %v1445_v56, 0 }
 0x304   : > { %v1971_v44 = vsel %vm359_vm1, %v1443_v52, 0  ;;  %v1444_v60 = vpack.c.bf16 %v1419_v57, %v1419_v57 }
 0x305   : > { %2638 = vmatpush3.bf16.msra.mxu1 %v1971_v44 }
 0x306   : > { %2649 = vmatprep.subr.bf16.mxu1 %v2826_v0  ;;  %v2014_v61 = vsel %vm359_vm1, %v1444_v60, 0 }
 0x308   : > { %2622 = vmatmul.mubr.msk.bf16.vlgmr.msra.gmra.mrb[72].mxu0 %vm355_vm2, %v3058_v54  ;;  %2640 = vmatmul.mubr.msk.bf16.vlgmr.msra.gmra.mrb[64].mxu1 %vm355_vm2, %v3096_v10  ;;  %v1446_v54 = vpack.c.bf16 %v2564_v55, %v2564_v55 }
 0x309   : > { %2632 = vmatpush3.bf16.msra.mxu0 %v1928_v59  ;;  %2633 = vmatprep.mubr.msk.bf16.mxu0 %vm2827_vm0, %v2826_v0 }
 0x30a   : > { %2643 = vmatprep.subr.bf16.mxu0 %v2826_v0  ;;  %2650 = vmatpush3.bf16.msra.mxu1 %v2057_v63  ;;  %v2100_v10 = vsel %vm359_vm1, %v1446_v54, 0 }
 0x30b   : > { %2651 = vmatprep.mubr.msk.bf16.mxu1 %vm2827_vm0, %v2826_v0 }
 0x310   : > { %2634 = vmatmul.mubr.msk.bf16.vlgmr.msra.gmra.mrb[76].mxu0 %vm355_vm2, %v3078_v1  ;;  %2652 = vmatmul.mubr.msk.bf16.vlgmr.msra.gmra.mrb[68].mxu1 %vm355_vm2, %v3112_v18  ;;  %v3257_v1 = vld [vmem:[%s3350_s5] ss:$0 sm:$0xff] }
 0x311   : > { %2644 = vmatpush3.bf16.msra.mxu0 %v2014_v61  ;;  %2645 = vmatprep.mubr.msk.bf16.mxu0 %vm2827_vm0, %v2826_v0 }
 0x312   : > { %2655 = vmatprep.subr.bf16.mxu0 %v2826_v0 }
 0x318   : > { %2646 = vmatmul.mubr.msk.bf16.vlgmr.msra.gmra.mrb[80].mxu0 %vm355_vm2, %v3098_v11 }
 0x319   : > { %2656 = vmatpush3.bf16.msra.mxu0 %v2100_v10  ;;  %2657 = vmatprep.mubr.msk.bf16.mxu0 %vm2827_vm0, %v2826_v0 }
 0x320   : > { %2658 = vmatmul.mubr.msk.bf16.vlgmr.msra.gmra.mrb[84].mxu0 %vm355_vm2, %v3114_v19 }
 0x3ab   : > { %v1491_v18 = vpop.f32.mrb[48].mxu0 }
 0x3ac   : > { %v1492_v62 = vadd.f32 %v3257_v1, %v1491_v18  ;;  %v2569_v3 = vpop.f32.mrb[49].mxu0 }
 0x3ad   : > { %v1494_v11 = vpop.f32.mrb[50].mxu0 }
 0x3ae   : > { %2142 = vst [vmem:[%s3260_s13] sm:$0xff] %v1492_v62  ;;  %v2570_v0 = vpop.f32.mrb[51].mxu0 }
 0x3b3   : > { %v1534_v19 = vpop.f32.mrb[52].mxu0 }
 0x3b4   : > { %v1535_v4 = vadd.f32 %v3257_v1, %v1534_v19  ;;  %v2575_v5 = vpop.f32.mrb[53].mxu0 }
 0x3b5   : > { %v1537_v6 = vpop.f32.mrb[54].mxu0 }
 0x3b6   : > { %2143 = vst [vmem:[%s3260_s13 + $0x8] sm:$0xff] %v1535_v4  ;;  %v2576_v7 = vpop.f32.mrb[55].mxu0 }
 0x3bb   : > { %v1577_v8 = vpop.f32.mrb[56].mxu0  ;;  %v1663_v9 = vpop.f32.mrb[48].mxu1 }
 0x3bc   : > { %v1578_v12 = vadd.f32 %v3257_v1, %v1577_v8  ;;  %v2581_v15 = vpop.f32.mrb[57].mxu0  ;;  %v1664_v16 = vadd.f32 %v3257_v1, %v1663_v9  ;;  %v2593_v17 = vpop.f32.mrb[49].mxu1 }
 0x3bd   : > { %v1580_v20 = vpop.f32.mrb[58].mxu0  ;;  %v1666_v21 = vpop.f32.mrb[50].mxu1 }
 0x3be   : > { %2144 = vst [vmem:[%s3260_s13 + $0x10] sm:$0xff] %v1578_v12  ;;  %v2582_v22 = vpop.f32.mrb[59].mxu0  ;;  %2146 = vst [vmem:[%s3260_s13 + $0x20] sm:$0xff] %v1664_v16  ;;  %v2594_v25 = vpop.f32.mrb[51].mxu1 }
 0x3c3   : > { %v1620_v26 = vpop.f32.mrb[60].mxu0  ;;  %v1749_v27 = vpop.f32.mrb[52].mxu1 }
 0x3c4   : > { %v1621_v2 = vadd.f32 %v3257_v1, %v1620_v26  ;;  %v2587_v28 = vpop.f32.mrb[61].mxu0  ;;  %v1750_v29 = vadd.f32 %v3257_v1, %v1749_v27  ;;  %v2605_v30 = vpop.f32.mrb[53].mxu1 }
 0x3c5   : > { %v1623_v31 = vpop.f32.mrb[62].mxu0  ;;  %v1752_v13 = vpop.f32.mrb[54].mxu1 }
 0x3c6   : > { %2145 = vst [vmem:[%s3260_s13 + $0x18] sm:$0xff] %v1621_v2  ;;  %v2588_v32 = vpop.f32.mrb[63].mxu0  ;;  %2148 = vst [vmem:[%s3260_s13 + $0x30] sm:$0xff] %v1750_v29  ;;  %v2606_v35 = vpop.f32.mrb[55].mxu1 }
 0x3cb   : > { %v1706_v36 = vpop.f32.mrb[64].mxu0  ;;  %v1835_v37 = vpop.f32.mrb[56].mxu1 }
 0x3cc   : > { %v1707_v38 = vadd.f32 %v3257_v1, %v1706_v36  ;;  %v2599_v14 = vpop.f32.mrb[65].mxu0  ;;  %v1836_v39 = vadd.f32 %v3257_v1, %v1835_v37  ;;  %v2617_v40 = vpop.f32.mrb[57].mxu1 }
 0x3cd   : > { %v1709_v41 = vpop.f32.mrb[66].mxu0  ;;  %v1838_v23 = vpop.f32.mrb[58].mxu1 }
 0x3ce   : > { %2147 = vst [vmem:[%s3260_s13 + $0x28] sm:$0xff] %v1707_v38  ;;  %v2600_v33 = vpop.f32.mrb[67].mxu0  ;;  %2150 = vst [vmem:[%s3260_s13 + $0x40] sm:$0xff] %v1836_v39  ;;  %v2618_v42 = vpop.f32.mrb[59].mxu1 }
 0x3d3   : > { %v1792_v45 = vpop.f32.mrb[68].mxu0  ;;  %v1921_v46 = vpop.f32.mrb[60].mxu1 }
 0x3d4   : > { %v1793_v47 = vadd.f32 %v3257_v1, %v1792_v45  ;;  %v2611_v48 = vpop.f32.mrb[69].mxu0  ;;  %v1922_v24 = vadd.f32 %v3257_v1, %v1921_v46  ;;  %v2629_v43 = vpop.f32.mrb[61].mxu1 }
 0x3d5   : > { %v1795_v49 = vpop.f32.mrb[70].mxu0  ;;  %v1924_v50 = vpop.f32.mrb[62].mxu1 }
 0x3d6   : > { %2149 = vst [vmem:[%s3260_s13 + $0x38] sm:$0xff] %v1793_v47  ;;  %v2612_v51 = vpop.f32.mrb[71].mxu0  ;;  %2152 = vst [vmem:[%s3260_s13 + $0x50] sm:$0xff] %v1922_v24  ;;  %v2630_v34 = vpop.f32.mrb[63].mxu1 }
 0x3db   : > { %v1878_v53 = vpop.f32.mrb[72].mxu0  ;;  %v2007_v52 = vpop.f32.mrb[64].mxu1 }
 0x3dc   : > { %v1879_v55 = vadd.f32 %v3257_v1, %v1878_v53  ;;  %v2623_v56 = vpop.f32.mrb[73].mxu0  ;;  %v2008_v57 = vadd.f32 %v3257_v1, %v2007_v52  ;;  %v2641_v58 = vpop.f32.mrb[65].mxu1 }
 0x3dd   : > { %v1881_v44 = vpop.f32.mrb[74].mxu0  ;;  %v2010_v63 = vpop.f32.mrb[66].mxu1 }
 0x3de   : > { %2151 = vst [vmem:[%s3260_s13 + $0x48] sm:$0xff] %v1879_v55  ;;  %v2624_v59 = vpop.f32.mrb[75].mxu0  ;;  %2154 = vst [vmem:[%s3260_s13 + $0x60] sm:$0xff] %v2008_v57  ;;  %v2642_v60 = vpop.f32.mrb[67].mxu1 }
 0x3e3   : > { %v1964_v61 = vpop.f32.mrb[76].mxu0  ;;  %v2093_v54 = vpop.f32.mrb[68].mxu1 }
 0x3e4   : > { %v1965_v10 = vadd.f32 %v3257_v1, %v1964_v61  ;;  %v2635_v18 = vpop.f32.mrb[77].mxu0  ;;  %v2094_v62 = vadd.f32 %v3257_v1, %v2093_v54  ;;  %v2653_v3 = vpop.f32.mrb[69].mxu1 }
 0x3e5   : > { %v1967_v11 = vpop.f32.mrb[78].mxu0  ;;  %v2096_v0 = vpop.f32.mrb[70].mxu1 }
 0x3e6   : > { %2153 = vst [vmem:[%s3260_s13 + $0x58] sm:$0xff] %v1965_v10  ;;  %v2636_v19 = vpop.f32.mrb[79].mxu0  ;;  %2156 = vst [vmem:[%s3260_s13 + $0x70] sm:$0xff] %v2094_v62  ;;  %v2654_v4 = vpop.f32.mrb[71].mxu1 }
 0x3eb   : > { %v2050_v5 = vpop.f32.mrb[80].mxu0 }
 0x3ec   : > { %v2051_v6 = vadd.f32 %v3257_v1, %v2050_v5  ;;  %v2647_v7 = vpop.f32.mrb[81].mxu0 }
 0x3ed   : > { %v2053_v8 = vpop.f32.mrb[82].mxu0 }
 0x3ee   : > { %2155 = vst [vmem:[%s3260_s13 + $0x68] sm:$0xff] %v2051_v6  ;;  %v2648_v9 = vpop.f32.mrb[83].mxu0 }
 0x3f3   : > { %v2136_v12 = vpop.f32.mrb[84].mxu0 }
 0x3f4   : > { %v2137_v15 = vadd.f32 %v3257_v1, %v2136_v12  ;;  %v2659_v16 = vpop.f32.mrb[85].mxu0 }
 0x3f5   : > { %v2139_v17 = vpop.f32.mrb[86].mxu0 }
 0x3f6   : > { %2157 = vst [vmem:[%s3260_s13 + $0x78] sm:$0xff] %v2137_v15  ;;  %v2660_v20 = vpop.f32.mrb[87].mxu0 }
 0x3f7   : > { %2768 = shalt.err (!%p2765_p7)
}
 0x3f8   : > { %s2769_s20 = scalar_lea.hbm %s3296_s15, 2048  ;;  %s2773_s29 = scalar_lea.hbm %s3351_s6, 4096 }
 0x3f9   : > { %p2770_p8 = scmp.ne.s32.totalorder %s3296_s15, %s2769_s20  ;;  %p2774_p1 = scmp.lt.u32.totalorder %s3296_s15, %s3351_s6 }
 0x3fa   : > { %p2775_p0 = scmp.lt.u32.totalorder %s2773_s29, %s2769_s20  ;;  %p2777_p6 = scmp.lt.u32.totalorder %s2769_s20, %s3296_s15 }
 0x3fb   : > { %p2771_p11 = pnand %p2770_p8, %p3362_p9 }
 0x3fc   : > { %p2776_p5 = por %p2775_p0, %p2774_p1 }
 0x3fd   : > { %p2772_p13 = pneg %p2771_p11 }
 0x3fe   : > { %p2778_p10 = por %p2777_p6, %p2776_p5 }
 0x400   : > { %p2779_p12 = pnand %p2778_p10, %p2772_p13 }
 0x402   : > { %2782 = shalt.err (!%p2779_p12)
}
 0x403   : > { %s2829_s9 = smov 128   ;;  %s2830_s12 = smov 8  }
 0x404   : > { %2665 = dma.vmem_to_hbm [thread:$0]  (%p3362_p9), %s3298_s11, 2048, %s3296_s15, %s3304_s25, %s2829_s9, %s2829_s9, %s2830_s12  }
 0x405 PF: > { %p2677_p2 = scmp.ge.s32.totalorder %s2821_s24, 2  ;;  %s2187_s14 = sand.u32 1, %s2809_s21  }
 0x406   : > { %p3363_p3 = scmp.ne.s32.totalorder %s3356_s8, 0  ;;  %s2188_s16 = scalar_lea.sflag [#allocation4], %s2187_s14 }
 0x408   : > { %p2672_p4 = pnand %p2677_p2, %p3363_p3 }
 0x40a   : > { %2804 = dma.done.wait (!%p2672_p4), %s2188_s16, 2048  }
 0x40b   : > { %2806 = vsyncadd (!%p2672_p4), %s2188_s16, 4294965248  ;;  %p17_p7 = scmp.ge.s32.totalorder %s2891_s27, 4   ;;  %s3364_s21 = smov %s2813_s22 }
 0x40c   : > { %s3365_s22 = smov %s2817_s23  ;;  %s3366_s23 = smov %s2902_s30 }
 0x40d   : > { %s3367_s24 = smov %s2891_s27  ;;  %19 = sbr.rel (!%p17_p7) target bundleno = 4 (0x4), region = 87 }
 0x414   :  { %2193 = vsyncpa [#allocation3], 1 }
 0x415   :  { %2195 = vsyncpa [#allocation3 + $0x1], 1 }
 0x416   :  { %2196 = vsyncpa [#allocation4], 1 }
 0x417   :  { %2198 = vsyncpa [#allocation4 + $0x1], 1 }

</bundles_post_ra>
